<compile_context>
chip_gen: v7x
topology: tpu7x:2x2x1
jax: 0.10.0
libtpu: 0.0.40
codegen_flags: <defaults>
</compile_context>

<pallas_src>
import functools

import jax
import jax.numpy as jnp
from jax.experimental import pallas as pl
from jax.experimental.pallas import tpu as pltpu

EPS = 1e-5  # nn.BatchNorm2d default eps


# ----------------------------------------------------------------------------
def _vmem_limit_bytes():
    """Scoped-VMEM limit per generation (48 MiB is safe everywhere)."""
    try:
        cap = getattr(pltpu.get_tpu_info(), "vmem_capacity_bytes", None)
    except Exception:
        cap = None
    if cap is not None and cap >= 96 * 1024 * 1024:
        return 64 * 1024 * 1024          # v5e / v6e (128 MiB physical VMEM)
    return 48 * 1024 * 1024              # v7x (64 MiB physical) or unknown


def _pick_tile(hw, *, f_g, f_l, f_int, chunk, io_bytes, budget_bytes):
    """Largest lane-aligned tile dividing H*W under a double-buffer-aware budget."""
    if hw % 128 != 0:
        # TODO(synk): add a padded/masked tail path for H*W not a multiple of 128.
        return hw
    # Worst-case per-lane VMEM bytes across the three passes (x2 = double buffer).
    bpl_p1 = 2 * (f_g + f_l) * io_bytes + 8 * f_int + 8          # inputs + f32 g1,x1
    bpl_p2 = 2 * (f_g + f_l + 1) * io_bytes + 4 * chunk + 8      # inputs + psi out + f32 h chunk
    bpl_p3 = 2 * (2 * f_l + 1) * io_bytes + 8                    # x,psi in + out + f32 sig
    bpl = max(bpl_p1, bpl_p2, bpl_p3)
    t_budget = max(128, budget_bytes // bpl)
    # keep per-step input traffic >= ~512 KiB so the ~0.35 us step cost is amortized
    t_traffic = (512 * 1024) // max(1, (f_g + f_l) * io_bytes)
    t = min(t_budget, max(4096, t_traffic))
    t = max(128, min(t, hw))
    t = (t // 128) * 128
    while t > 128 and hw % t != 0:
        t -= 128
    return t if hw % t == 0 else hw


# ----------------------------------------------------------------------------
# Pass 1: per-(batch, channel) stats (sum, sum of squares) of the raw branch
# convolutions g1_raw = Wg @ g, x1_raw = Wx @ x, accumulated over the spatial
# grid axis.  Accumulators are per-N so the N grid axis stays "parallel"
# (both v7x TensorCores busy); the tiny sum over N happens in XLA afterwards.
def _stats_kernel(g_ref, x_ref, wg_ref, wx_ref,
                  sg_ref, sg2_ref, sx_ref, sx2_ref):
    @pl.when(pl.program_id(1) == 0)
    def _():
        sg_ref[...] = jnp.zeros_like(sg_ref)
        sg2_ref[...] = jnp.zeros_like(sg2_ref)
        sx_ref[...] = jnp.zeros_like(sx_ref)
        sx2_ref[...] = jnp.zeros_like(sx2_ref)

    g = g_ref[0]                                                   # (F_g, t) io dtype
    x = x_ref[0]                                                   # (F_l, t) io dtype
    g1 = jnp.dot(wg_ref[...], g, preferred_element_type=jnp.float32)   # (F_int, t) f32
    x1 = jnp.dot(wx_ref[...], x, preferred_element_type=jnp.float32)
    sg_ref[0] += jnp.sum(g1, axis=-1, keepdims=True)
    sg2_ref[0] += jnp.sum(g1 * g1, axis=-1, keepdims=True)
    sx_ref[0] += jnp.sum(x1, axis=-1, keepdims=True)
    sx2_ref[0] += jnp.sum(x1 * x1, axis=-1, keepdims=True)


# ----------------------------------------------------------------------------
# Pass 2: h = relu(scale_g*g1_raw + scale_x*x1_raw + shift) with the BN scale
# folded into the (io-dtype) conv weights, then the psi 1x1 conv (F_int -> 1)
# as a VPU multiply + sublane reduce.  F_int is chunked so the f32
# intermediate never exceeds (chunk, t).  Also accumulates the psi BN(1)
# statistics (per-N partial sum / sumsq) so no extra HBM pass is needed.
def _psi_raw_kernel(g_ref, x_ref, wg_ref, wx_ref, shift_ref, wp_ref,
                    psi_ref, ps_ref, ps2_ref, *, chunk):
    @pl.when(pl.program_id(1) == 0)
    def _():
        ps_ref[...] = jnp.zeros_like(ps_ref)
        ps2_ref[...] = jnp.zeros_like(ps2_ref)

    g = g_ref[0]                                                   # (F_g, t)
    x = x_ref[0]                                                   # (F_l, t)
    f_int = wg_ref.shape[0]
    t = g.shape[-1]
    psi = jnp.zeros((1, t), jnp.float32)
    for c0 in range(0, f_int, chunk):                              # static unroll
        c1 = min(c0 + chunk, f_int)
        h = jnp.dot(wg_ref[c0:c1, :], g, preferred_element_type=jnp.float32)
        h = h + jnp.dot(wx_ref[c0:c1, :], x, preferred_element_type=jnp.float32)
        h = jnp.maximum(h + shift_ref[c0:c1, :], 0.0)              # (c, t) f32
        psi = psi + jnp.sum(wp_ref[c0:c1, :] * h, axis=0, keepdims=True)
    psi_ref[0] = psi.astype(psi_ref.dtype)                         # (1, t) io dtype
    ps_ref[0] += jnp.sum(psi, axis=-1, keepdims=True)              # (1, 1) f32
    ps2_ref[0] += jnp.sum(psi * psi, axis=-1, keepdims=True)


# ----------------------------------------------------------------------------
# Pass 3: psi = sigmoid(scale * psi_raw + shift);  out = x * psi.
# In the bf16 path the gating multiply runs in bf16 (native VALU on v6e/v7x,
# compiler-expanded on v5e); exp / reciprocal stay f32 on the EUP.
def _gate_kernel(x_ref, psi_ref, scale_ref, shift_ref, out_ref, *,
                 exact_sigmoid, f32_mul):
    z = psi_ref[0].astype(jnp.float32) * scale_ref[...] + shift_ref[...]  # (1, t)
    e = jnp.exp(-z)                                                 # EUP
    if exact_sigmoid:
        sig = 1.0 / (1.0 + e)
    else:
        sig = pl.reciprocal(1.0 + e, approx=True)                   # EUP slot
    if f32_mul:
        out_ref[0] = (x_ref[0].astype(jnp.float32) * sig).astype(out_ref.dtype)
    else:
        out_ref[0] = x_ref[0] * sig.astype(out_ref.dtype)


# ----------------------------------------------------------------------------
def attention_block(g, x, params, *, io_dtype=jnp.bfloat16, t_hw=None):
    """g: (N, F_g, H, W), x: (N, F_l, H, W) NCHW.  Returns (N, F_l, H, W)."""
    N, F_g, H, W = g.shape
    _, F_l, _, _ = x.shape
    F_int = params["wg"].shape[0]
    HW = H * W
    M = N * HW
    f32 = jnp.float32
    io_dtype = jnp.dtype(io_dtype)
    io_bytes = io_dtype.itemsize
    chunk = min(F_int, 64)

    vmem_limit = _vmem_limit_bytes()
    if t_hw is None:
        t_hw = _pick_tile(HW, f_g=F_g, f_l=F_l, f_int=F_int, chunk=chunk,
                          io_bytes=io_bytes, budget_bytes=vmem_limit // 2)
    assert HW % t_hw == 0 and (t_hw % 128 == 0 or t_hw == HW)
    n_t = HW // t_hw
    grid = (N, n_t)

    # Lane-dense layout: NCHW -> (N, C, H*W) is a free reshape (no transpose).
    g3 = g.reshape(N, F_g, HW).astype(io_dtype)
    x3 = x.reshape(N, F_l, HW).astype(io_dtype)

    # 1x1-conv weights, PyTorch layout (C_out, C_in).  f32 masters for the BN
    # fold; matmul operands cast to the I/O dtype (native bf16 MXU, no per-tile
    # f32 promotion of the activations).
    wg_f32 = params["wg"].astype(f32)                    # (F_int, F_g)
    wx_f32 = params["wx"].astype(f32)                    # (F_int, F_l)
    wp = params["wp"].astype(f32).reshape(F_int, 1)      # (F_int, 1), stays f32
    wg_io = wg_f32.astype(io_dtype)
    wx_io = wx_f32.astype(io_dtype)

    def gx_spec(C):
        return pl.BlockSpec((1, C, t_hw), lambda n, j: (n, 0, j))

    def const_spec(shape):
        return pl.BlockSpec(shape, lambda n, j, _s=len(shape): (0,) * _s)

    psi_spec = pl.BlockSpec((1, 1, t_hw), lambda n, j: (n, 0, j))
    stat_spec = pl.BlockSpec((1, F_int, 1), lambda n, j: (n, 0, 0))
    scalar_spec = pl.BlockSpec((1, 1, 1), lambda n, j: (n, 0, 0))

    cp_reduce = pltpu.CompilerParams(
        dimension_semantics=("parallel", "arbitrary"),
        vmem_limit_bytes=vmem_limit)
    cp_parallel = pltpu.CompilerParams(
        dimension_semantics=("parallel", "parallel"),
        vmem_limit_bytes=vmem_limit)

    # -------- pass 1: branch batch statistics (per-N partial sum / sumsq) ----
    stat = jax.ShapeDtypeStruct((N, F_int, 1), f32)
    sg, sg2, sx, sx2 = pl.pallas_call(
        _stats_kernel,
        grid=grid,
        in_specs=[gx_spec(F_g), gx_spec(F_l),
                  const_spec((F_int, F_g)), const_spec((F_int, F_l))],
        out_specs=[stat_spec] * 4,
        out_shape=[stat] * 4,
        compiler_params=cp_reduce,
    )(g3, x3, wg_io, wx_io)

    # Fold training-mode BN (biased variance) into per-channel scale/shift.
    # Conv biases cancel under the mean subtraction, so they never appear.
    # NOTE: single-pass sumsq variance can cancel if |mean| >> std; clamped >= 0.
    def fold(s, s2, gamma, beta):
        mean = jnp.sum(s[:, :, 0], axis=0) / M
        var = jnp.maximum(jnp.sum(s2[:, :, 0], axis=0) / M - mean * mean, 0.0)
        scale = gamma * jax.lax.rsqrt(var + EPS)
        return scale, beta - scale * mean

    scale_g, shift_g = fold(sg, sg2, params["gam_g"], params["bet_g"])
    scale_x, shift_x = fold(sx, sx2, params["gam_x"], params["bet_x"])
    wg_s = (scale_g[:, None] * wg_f32).astype(io_dtype)   # BN scale folded into W
    wx_s = (scale_x[:, None] * wx_f32).astype(io_dtype)
    shift_gx = (shift_g + shift_x).reshape(F_int, 1).astype(f32)

    # -------- pass 2: relu(BN(g1)+BN(x1)), psi projection and psi statistics -
    psi_kernel = functools.partial(_psi_raw_kernel, chunk=chunk)
    psi_raw, psum, psumsq = pl.pallas_call(
        psi_kernel,
        grid=grid,
        in_specs=[gx_spec(F_g), gx_spec(F_l),
                  const_spec((F_int, F_g)), const_spec((F_int, F_l)),
                  const_spec((F_int, 1)), const_spec((F_int, 1))],
        out_specs=[psi_spec, scalar_spec, scalar_spec],
        out_shape=[jax.ShapeDtypeStruct((N, 1, HW), io_dtype),
                   jax.ShapeDtypeStruct((N, 1, 1), f32),
                   jax.ShapeDtypeStruct((N, 1, 1), f32)],
        compiler_params=cp_reduce,
    )(g3, x3, wg_s, wx_s, shift_gx, wp)

    # psi BatchNorm(1) fold: stats came out of pass 2, only a tiny (N,) sum here.
    psi_mean = jnp.sum(psum) / M
    psi_var = jnp.maximum(jnp.sum(psumsq) / M - psi_mean * psi_mean, 0.0)
    psi_scale = params["gam_p"].reshape(()) * jax.lax.rsqrt(psi_var + EPS)
    psi_shift = params["bet_p"].reshape(()) - psi_scale * psi_mean
    psi_scale_arr = psi_scale.reshape(1, 1).astype(f32)
    psi_shift_arr = psi_shift.reshape(1, 1).astype(f32)

    # -------- pass 3: sigmoid + gating ---------------------------------------
    is_f32 = io_dtype == jnp.dtype(jnp.float32)
    gate = functools.partial(_gate_kernel, exact_sigmoid=is_f32, f32_mul=is_f32)
    out3 = pl.pallas_call(
        gate,
        grid=grid,
        in_specs=[gx_spec(F_l), psi_spec,
                  const_spec((1, 1)), const_spec((1, 1))],
        out_specs=pl.BlockSpec((1, F_l, t_hw), lambda n, j: (n, 0, j)),
        out_shape=jax.ShapeDtypeStruct((N, F_l, HW), io_dtype),
        compiler_params=cp_parallel,
    )(x3, psi_raw, psi_scale_arr, psi_shift_arr)

    return out3.reshape(N, F_l, H, W)


# ----------------------------------------------------------------------------
def init_params(key, F_g, F_l, F_int):
    ks = jax.random.split(key, 9)
    f32 = jnp.float32
    return {
        # W_g: Conv2d(F_g, F_int, 1, bias=True) + BN(F_int)
        "wg":    0.2 * jax.random.normal(ks[0], (F_int, F_g), f32),
        "bg":    0.1 * jax.random.normal(ks[1], (F_int,), f32),
        "gam_g": 1.0 + 0.1 * jax.random.normal(ks[2], (F_int,), f32),
        "bet_g": 0.1 * jax.random.normal(ks[3], (F_int,), f32),
        # W_x: Conv2d(F_l, F_int, 1, bias=True) + BN(F_int)
        "wx":    0.2 * jax.random.normal(ks[4], (F_int, F_l), f32),
        "bx":    0.1 * jax.random.normal(ks[5], (F_int,), f32),
        "gam_x": 1.0 + 0.1 * jax.random.normal(ks[6], (F_int,), f32),
        "bet_x": 0.1 * jax.random.normal(ks[7], (F_int,), f32),
        # psi: Conv2d(F_int, 1, 1, bias=True) + BN(1) + Sigmoid
        "wp":    0.2 * jax.random.normal(ks[8], (1, F_int), f32),
        "bp":    jnp.full((1,), 0.05, f32),
        "gam_p": jnp.full((1,), 1.1, f32),
        "bet_p": jnp.full((1,), -0.05, f32),
    }


def reference_jax(g, x, p):
    """Pure-JAX PyTorch-equivalent reference (conv biases included)."""
    N, F_g, H, W = g.shape
    F_l = x.shape[1]

    def conv1x1(inp, w, b):
        return jnp.einsum("oc,nch->noh", w, inp) + b[None, :, None]

    def bn_train(y, gamma, beta):
        mean = jnp.mean(y, axis=(0, 2), keepdims=True)
        var = jnp.mean((y - mean) ** 2, axis=(0, 2), keepdims=True)
        yn = (y - mean) * jax.lax.rsqrt(var + EPS)
        return yn * gamma[None, :, None] + beta[None, :, None]

    gf = g.reshape(N, F_g, H * W)
    xf = x.reshape(N, F_l, H * W)
    g1 = bn_train(conv1x1(gf, p["wg"], p["bg"]), p["gam_g"], p["bet_g"])
    x1 = bn_train(conv1x1(xf, p["wx"], p["bx"]), p["gam_x"], p["bet_x"])
    h = jnp.maximum(g1 + x1, 0.0)
    ps = bn_train(conv1x1(h, p["wp"], p["bp"]), p["gam_p"], p["bet_p"])
    psi = 1.0 / (1.0 + jnp.exp(-ps))
    return (xf * psi).reshape(N, F_l, H, W)


if __name__ == "__main__":
    key = jax.random.PRNGKey(0)
    k_g, k_x, k_p = jax.random.split(key, 3)

    N, F_g, F_l, F_int, H, W = 2, 4, 4, 8, 16, 16
    g = jax.random.normal(k_g, (N, F_g, H, W), jnp.float32)
    x = jax.random.normal(k_x, (N, F_l, H, W), jnp.float32)
    params = init_params(k_p, F_g, F_l, F_int)

    # f32 I/O path: exact sigmoid, tight check vs the PyTorch-equivalent ref
    # (t_hw=128 so the tiled per-N BN accumulation is actually exercised).
    out_f32 = jax.block_until_ready(
        attention_block(g, x, params, io_dtype=jnp.float32, t_hw=128))
    ref_f32 = jax.block_until_ready(reference_jax(g, x, params))
    assert out_f32.shape == (N, F_l, H, W)
    assert jnp.allclose(out_f32, ref_f32, atol=1e-4, rtol=1e-4), float(
        jnp.max(jnp.abs(out_f32 - ref_f32)))

    # bf16-at-HBM path (default / perf mode) with the automatic tile picker.
    # Reference sees the same bf16-quantized inputs and branch-conv weights;
    # tolerance covers bf16 psi_raw / output rounding + approx reciprocal.
    out_bf16 = jax.block_until_ready(
        attention_block(g, x, params, io_dtype=jnp.bfloat16))
    g_q = g.astype(jnp.bfloat16).astype(jnp.float32)
    x_q = x.astype(jnp.bfloat16).astype(jnp.float32)
    params_q = dict(params)
    params_q["wg"] = params["wg"].astype(jnp.bfloat16).astype(jnp.float32)
    params_q["wx"] = params["wx"].astype(jnp.bfloat16).astype(jnp.float32)
    ref_bf16 = jax.block_until_ready(reference_jax(g_q, x_q, params_q))
    assert jnp.allclose(out_bf16.astype(jnp.float32), ref_bf16,
                        atol=5e-2, rtol=5e-2)

    print("KERNEL_OK")
</pallas_src>

<mosaic_0001>
module attributes {stable_mosaic.version = 11 : i64} {
  func.func @_stats_kernel(%arg0: i32, %arg1: i32, %arg2: memref<1x4x128xf32, #tpu.memory_space<vmem>>, %arg3: memref<1x4x128xf32, #tpu.memory_space<vmem>>, %arg4: memref<8x4xf32, #tpu.memory_space<vmem>>, %arg5: memref<8x4xf32, #tpu.memory_space<vmem>>, %arg6: memref<1x8x1xf32, #tpu.memory_space<vmem>>, %arg7: memref<1x8x1xf32, #tpu.memory_space<vmem>>, %arg8: memref<1x8x1xf32, #tpu.memory_space<vmem>>, %arg9: memref<1x8x1xf32, #tpu.memory_space<vmem>>) attributes {dimension_semantics = [#tpu.dimension_semantics<parallel>, #tpu.dimension_semantics<arbitrary>], iteration_bounds = array<i64: 2, 2>, scalar_prefetch = 0 : i64, scratch_operands = 0 : i64, tpu.core_type = #tpu.core_type<tc>, window_params = [{transform_indices = @transform_0, window_bounds = array<i64: 1, 4, 128>}, {transform_indices = @transform_1, window_bounds = array<i64: 1, 4, 128>}, {pipeline_mode = #tpu.pipeline_mode<synchronous>, transform_indices = @transform_2, window_bounds = array<i64: 8, 4>}, {pipeline_mode = #tpu.pipeline_mode<synchronous>, transform_indices = @transform_3, window_bounds = array<i64: 8, 4>}, {transform_indices = @transform_4, window_bounds = array<i64: 1, 8, 1>}, {transform_indices = @transform_5, window_bounds = array<i64: 1, 8, 1>}, {transform_indices = @transform_6, window_bounds = array<i64: 1, 8, 1>}, {transform_indices = @transform_7, window_bounds = array<i64: 1, 8, 1>}]} {
    %c0_i32 = arith.constant 0 : i32
    %0 = arith.cmpi eq, %arg1, %c0_i32 : i32
    %1 = arith.extui %0 : i1 to i32
    %c0_i32_0 = arith.constant 0 : i32
    %2 = arith.cmpi ne, %1, %c0_i32_0 : i32
    scf.if %2 {
      %cst_39 = arith.constant 0.000000e+00 : f32
      %45 = vector.broadcast %cst_39 : f32 to vector<1x8x1xf32>
      %c0_40 = arith.constant 0 : index
      %c0_41 = arith.constant 0 : index
      %c0_42 = arith.constant 0 : index
      %46 = vector.load %arg6[%c0_40, %c0_41, %c0_42] : memref<1x8x1xf32, #tpu.memory_space<vmem>>, vector<1x8x1xf32>
      tpu.vector_store %arg6[%c0_40, %c0_41, %c0_42], %45 {strides = array<i32>} : memref<1x8x1xf32, #tpu.memory_space<vmem>>, vector<1x8x1xf32>,
      %cst_43 = arith.constant 0.000000e+00 : f32
      %47 = vector.broadcast %cst_43 : f32 to vector<1x8x1xf32>
      %c0_44 = arith.constant 0 : index
      %c0_45 = arith.constant 0 : index
      %c0_46 = arith.constant 0 : index
      %48 = vector.load %arg7[%c0_44, %c0_45, %c0_46] : memref<1x8x1xf32, #tpu.memory_space<vmem>>, vector<1x8x1xf32>
      tpu.vector_store %arg7[%c0_44, %c0_45, %c0_46], %47 {strides = array<i32>} : memref<1x8x1xf32, #tpu.memory_space<vmem>>, vector<1x8x1xf32>,
      %cst_47 = arith.constant 0.000000e+00 : f32
      %49 = vector.broadcast %cst_47 : f32 to vector<1x8x1xf32>
      %c0_48 = arith.constant 0 : index
      %c0_49 = arith.constant 0 : index
      %c0_50 = arith.constant 0 : index
      %50 = vector.load %arg8[%c0_48, %c0_49, %c0_50] : memref<1x8x1xf32, #tpu.memory_space<vmem>>, vector<1x8x1xf32>
      tpu.vector_store %arg8[%c0_48, %c0_49, %c0_50], %49 {strides = array<i32>} : memref<1x8x1xf32, #tpu.memory_space<vmem>>, vector<1x8x1xf32>,
      %cst_51 = arith.constant 0.000000e+00 : f32
      %51 = vector.broadcast %cst_51 : f32 to vector<1x8x1xf32>
      %c0_52 = arith.constant 0 : index
      %c0_53 = arith.constant 0 : index
      %c0_54 = arith.constant 0 : index
      %52 = vector.load %arg9[%c0_52, %c0_53, %c0_54] : memref<1x8x1xf32, #tpu.memory_space<vmem>>, vector<1x8x1xf32>
      tpu.vector_store %arg9[%c0_52, %c0_53, %c0_54], %51 {strides = array<i32>} : memref<1x8x1xf32, #tpu.memory_space<vmem>>, vector<1x8x1xf32>,
    } else {
    }
    %c0 = arith.constant 0 : index
    %c0_1 = arith.constant 0 : index
    %c0_2 = arith.constant 0 : index
    %3 = vector.load %arg2[%c0, %c0_1, %c0_2] : memref<1x4x128xf32, #tpu.memory_space<vmem>>, vector<1x4x128xf32>
    %4 = vector.shape_cast %3 : vector<1x4x128xf32> to vector<4x128xf32>
    %c0_3 = arith.constant 0 : index
    %c0_4 = arith.constant 0 : index
    %c0_5 = arith.constant 0 : index
    %5 = vector.load %arg3[%c0_3, %c0_4, %c0_5] : memref<1x4x128xf32, #tpu.memory_space<vmem>>, vector<1x4x128xf32>
    %6 = vector.shape_cast %5 : vector<1x4x128xf32> to vector<4x128xf32>
    %c0_6 = arith.constant 0 : index
    %c0_7 = arith.constant 0 : index
    %7 = vector.load %arg4[%c0_6, %c0_7] : memref<8x4xf32, #tpu.memory_space<vmem>>, vector<8x4xf32>
    %cst = arith.constant dense<0.000000e+00> : vector<8x128xf32>
    %8 = tpu.matmul %7, %4, %cst {dimension_numbers = #tpu.dot_dimension_numbers<[1], [0], [0], [1], [0, 0, 1, 1], [], []>} : vector<8x4xf32>, vector<4x128xf32>, vector<8x128xf32> -> vector<8x128xf32>
    %c0_8 = arith.constant 0 : index
    %c0_9 = arith.constant 0 : index
    %9 = vector.load %arg5[%c0_8, %c0_9] : memref<8x4xf32, #tpu.memory_space<vmem>>, vector<8x4xf32>
    %cst_10 = arith.constant dense<0.000000e+00> : vector<8x128xf32>
    %10 = tpu.matmul %9, %6, %cst_10 {dimension_numbers = #tpu.dot_dimension_numbers<[1], [0], [0], [1], [0, 0, 1, 1], [], []>} : vector<8x4xf32>, vector<4x128xf32>, vector<8x128xf32> -> vector<8x128xf32>
    %c0_11 = arith.constant 0 : index
    %c0_12 = arith.constant 0 : index
    %c0_13 = arith.constant 0 : index
    %11 = vector.load %arg6[%c0_11, %c0_12, %c0_13] : memref<1x8x1xf32, #tpu.memory_space<vmem>>, vector<1x8x1xf32>
    %12 = vector.shape_cast %11 : vector<1x8x1xf32> to vector<8x1xf32>
    %cst_14 = arith.constant dense<0.000000e+00> : vector<8xf32>
    %13 = vector.multi_reduction <add>, %8, %cst_14 [1] : vector<8x128xf32> to vector<8xf32>
    %14 = vector.shape_cast %13 : vector<8xf32> to vector<8x1xf32>
    %15 = arith.addf %12, %14 : vector<8x1xf32>
    %c0_15 = arith.constant 0 : index
    %c0_16 = arith.constant 0 : index
    %c0_17 = arith.constant 0 : index
    %16 = vector.load %arg6[%c0_15, %c0_16, %c0_17] : memref<1x8x1xf32, #tpu.memory_space<vmem>>, vector<1x8x1xf32>
    %17 = vector.shape_cast %16 : vector<1x8x1xf32> to vector<8x1xf32>
    %18 = vector.shape_cast %15 : vector<8x1xf32> to vector<1x8x1xf32>
    tpu.vector_store %arg6[%c0_15, %c0_16, %c0_17], %18 {strides = array<i32>} : memref<1x8x1xf32, #tpu.memory_space<vmem>>, vector<1x8x1xf32>,
    %c0_18 = arith.constant 0 : index
    %c0_19 = arith.constant 0 : index
    %c0_20 = arith.constant 0 : index
    %19 = vector.load %arg7[%c0_18, %c0_19, %c0_20] : memref<1x8x1xf32, #tpu.memory_space<vmem>>, vector<1x8x1xf32>
    %20 = vector.shape_cast %19 : vector<1x8x1xf32> to vector<8x1xf32>
    %21 = arith.mulf %8, %8 : vector<8x128xf32>
    %cst_21 = arith.constant dense<0.000000e+00> : vector<8xf32>
    %22 = vector.multi_reduction <add>, %21, %cst_21 [1] : vector<8x128xf32> to vector<8xf32>
    %23 = vector.shape_cast %22 : vector<8xf32> to vector<8x1xf32>
    %24 = arith.addf %20, %23 : vector<8x1xf32>
    %c0_22 = arith.constant 0 : index
    %c0_23 = arith.constant 0 : index
    %c0_24 = arith.constant 0 : index
    %25 = vector.load %arg7[%c0_22, %c0_23, %c0_24] : memref<1x8x1xf32, #tpu.memory_space<vmem>>, vector<1x8x1xf32>
    %26 = vector.shape_cast %25 : vector<1x8x1xf32> to vector<8x1xf32>
    %27 = vector.shape_cast %24 : vector<8x1xf32> to vector<1x8x1xf32>
    tpu.vector_store %arg7[%c0_22, %c0_23, %c0_24], %27 {strides = array<i32>} : memref<1x8x1xf32, #tpu.memory_space<vmem>>, vector<1x8x1xf32>,
    %c0_25 = arith.constant 0 : index
    %c0_26 = arith.constant 0 : index
    %c0_27 = arith.constant 0 : index
    %28 = vector.load %arg8[%c0_25, %c0_26, %c0_27] : memref<1x8x1xf32, #tpu.memory_space<vmem>>, vector<1x8x1xf32>
    %29 = vector.shape_cast %28 : vector<1x8x1xf32> to vector<8x1xf32>
    %cst_28 = arith.constant dense<0.000000e+00> : vector<8xf32>
    %30 = vector.multi_reduction <add>, %10, %cst_28 [1] : vector<8x128xf32> to vector<8xf32>
    %31 = vector.shape_cast %30 : vector<8xf32> to vector<8x1xf32>
    %32 = arith.addf %29, %31 : vector<8x1xf32>
    %c0_29 = arith.constant 0 : index
    %c0_30 = arith.constant 0 : index
    %c0_31 = arith.constant 0 : index
    %33 = vector.load %arg8[%c0_29, %c0_30, %c0_31] : memref<1x8x1xf32, #tpu.memory_space<vmem>>, vector<1x8x1xf32>
    %34 = vector.shape_cast %33 : vector<1x8x1xf32> to vector<8x1xf32>
    %35 = vector.shape_cast %32 : vector<8x1xf32> to vector<1x8x1xf32>
    tpu.vector_store %arg8[%c0_29, %c0_30, %c0_31], %35 {strides = array<i32>} : memref<1x8x1xf32, #tpu.memory_space<vmem>>, vector<1x8x1xf32>,
    %c0_32 = arith.constant 0 : index
    %c0_33 = arith.constant 0 : index
    %c0_34 = arith.constant 0 : index
    %36 = vector.load %arg9[%c0_32, %c0_33, %c0_34] : memref<1x8x1xf32, #tpu.memory_space<vmem>>, vector<1x8x1xf32>
    %37 = vector.shape_cast %36 : vector<1x8x1xf32> to vector<8x1xf32>
    %38 = arith.mulf %10, %10 : vector<8x128xf32>
    %cst_35 = arith.constant dense<0.000000e+00> : vector<8xf32>
    %39 = vector.multi_reduction <add>, %38, %cst_35 [1] : vector<8x128xf32> to vector<8xf32>
    %40 = vector.shape_cast %39 : vector<8xf32> to vector<8x1xf32>
    %41 = arith.addf %37, %40 : vector<8x1xf32>
    %c0_36 = arith.constant 0 : index
    %c0_37 = arith.constant 0 : index
    %c0_38 = arith.constant 0 : index
    %42 = vector.load %arg9[%c0_36, %c0_37, %c0_38] : memref<1x8x1xf32, #tpu.memory_space<vmem>>, vector<1x8x1xf32>
    %43 = vector.shape_cast %42 : vector<1x8x1xf32> to vector<8x1xf32>
    %44 = vector.shape_cast %41 : vector<8x1xf32> to vector<1x8x1xf32>
    tpu.vector_store %arg9[%c0_36, %c0_37, %c0_38], %44 {strides = array<i32>} : memref<1x8x1xf32, #tpu.memory_space<vmem>>, vector<1x8x1xf32>,
    return
  }
  func.func @transform_0(%arg0: i32, %arg1: i32) -> (i32, i32, i32) {
    %c0_i32 = arith.constant 0 : i32
    %c0_i32_0 = arith.constant 0 : i32
    return %arg0, %c0_i32, %arg1 : i32, i32, i32
  }
  func.func @transform_1(%arg0: i32, %arg1: i32) -> (i32, i32, i32) {
    %c0_i32 = arith.constant 0 : i32
    %c0_i32_0 = arith.constant 0 : i32
    return %arg0, %c0_i32, %arg1 : i32, i32, i32
  }
  func.func @transform_2(%arg0: i32, %arg1: i32) -> (i32, i32) {
    %c0_i32 = arith.constant 0 : i32
    %c0_i32_0 = arith.constant 0 : i32
    %c0_i32_1 = arith.constant 0 : i32
    return %c0_i32, %c0_i32_0 : i32, i32
  }
  func.func @transform_3(%arg0: i32, %arg1: i32) -> (i32, i32) {
    %c0_i32 = arith.constant 0 : i32
    %c0_i32_0 = arith.constant 0 : i32
    %c0_i32_1 = arith.constant 0 : i32
    return %c0_i32, %c0_i32_0 : i32, i32
  }
  func.func @transform_4(%arg0: i32, %arg1: i32) -> (i32, i32, i32) {
    %c0_i32 = arith.constant 0 : i32
    %c0_i32_0 = arith.constant 0 : i32
    %c0_i32_1 = arith.constant 0 : i32
    return %arg0, %c0_i32, %c0_i32_0 : i32, i32, i32
  }
  func.func @transform_5(%arg0: i32, %arg1: i32) -> (i32, i32, i32) {
    %c0_i32 = arith.constant 0 : i32
    %c0_i32_0 = arith.constant 0 : i32
    %c0_i32_1 = arith.constant 0 : i32
    return %arg0, %c0_i32, %c0_i32_0 : i32, i32, i32
  }
  func.func @transform_6(%arg0: i32, %arg1: i32) -> (i32, i32, i32) {
    %c0_i32 = arith.constant 0 : i32
    %c0_i32_0 = arith.constant 0 : i32
    %c0_i32_1 = arith.constant 0 : i32
    return %arg0, %c0_i32, %c0_i32_0 : i32, i32, i32
  }
  func.func @transform_7(%arg0: i32, %arg1: i32) -> (i32, i32, i32) {
    %c0_i32 = arith.constant 0 : i32
    %c0_i32_0 = arith.constant 0 : i32
    %c0_i32_1 = arith.constant 0 : i32
    return %arg0, %c0_i32, %c0_i32_0 : i32, i32, i32
  }
}

</mosaic_0001>

<bundles_post_ra>
// kernel: tpu_custom_call.1
= control target key start
LH: loop header
LB: loop body
LE: loop exit
PB: predicated region body
PF: predicated region fallthrough
CT: control target
= control target key end

     0   :  { %s1197_s0 = inlined_call_operand.vmem [shape: f32[2,4,256], index: 0, kind: input, shape index: {}]   ;;  %s1198_s1 = inlined_call_operand.hbm [shape: f32[2,4,256], index: 1, kind: input, shape index: {}]   ;;  %s1199_s2 = inlined_call_operand.vmem [shape: f32[8,4], index: 2, kind: input, shape index: {}]   ;;  %s1200_s3 = inlined_call_operand.vmem [shape: f32[8,4], index: 3, kind: input, shape index: {}]   ;;  %s1201_s4 = inlined_call_operand.vmem [shape: f32[2,8,1], index: 4, kind: output, shape index: {0}]   ;;  %s1202_s5 = inlined_call_operand.vmem [shape: f32[2,8,1], index: 5, kind: output, shape index: {1}]   ;;  %s1203_s6 = inlined_call_operand.vmem [shape: f32[2,8,1], index: 6, kind: output, shape index: {2}]   ;;  %s1204_s7 = inlined_call_operand.vmem [shape: f32[2,8,1], index: 7, kind: output, shape index: {3}]  }
   0x1   :  { %1206 = sst [smem:[#allocation6_spill]] %s1198_s1 }
   0x2   :  { %1207 = sst [smem:[#allocation7_spill]] %s1199_s2 }
   0x3   :  { %1208 = sst [smem:[#allocation8_spill]] %s1200_s3 }
   0x4   :  { %13 = vsyncpa [#allocation3], 0 }
   0x5   :  { %15 = vsyncpa [#allocation3 + $0x1], 0  ;;  %s1003_s24 = smov 0   ;;  %s1005_s25 = smov 0  }
   0x6   :  { %s1007_s26 = smov 0   ;;  %s1009_s27 = smov 0  }
   0x7   :  { %s1011_s28 = smov 0   ;;  %s1013_s29 = smov 0  }
   0x8   :  { %s1015_s30 = smov 0   ;;  %s1017_s8 = smov 0  }
   0x9 LB: > { %s751_s9 = sadd.s32 4294967295, %s957_s8   ;;  %s30_s10 = sadd.s32 1, %s949_s29  ;;  %s957_s8 = sphi %s1017_s8, %s21_s8   ;;  %s953_s30 = sphi %s1015_s30, %s1225_s30   ;;  %s949_s29 = sphi %s1013_s29, %s1224_s29   ;;  %s945_s28 = sphi %s1011_s28, %s1223_s28   ;;  %s941_s27 = sphi %s1009_s27, %s1222_s27   ;;  %s937_s26 = sphi %s1007_s26, %s1221_s26   ;;  %s933_s25 = sphi %s1005_s25, %s1220_s25   ;;  %s929_s24 = sphi %s1003_s24, %s1219_s24  }
   0xa   : > { %p31_p0 = scmp.ge.s32.totalorder %s30_s10, 2  ;;  %s33_s11 = sadd.s32 1, %s953_s30 }
   0xb   : > { %s70_s12 = sadd.s32 1, %s937_s26  ;;  %p77_p1 = scmp.ne.s32.totalorder %s937_s26, %s933_s25 }
   0xc   : > { %s1227_s10 = smov (%p31_p0, %s30_s10), 0  ;;  %s1229_s11 = smov (!%p31_p0, %s33_s11), %s953_s30 }
   0xd   : > { %1209 = sst [smem:[#allocation5_spill]] %s1227_s10  ;;  %s66_s13 = ssub.s32 %s949_s29, %s1227_s10 }
   0xe   : > { %p78_p2 = scmp.eq.s32.totalorder %s957_s8, 0  ;;  %p35_p3 = scmp.ge.s32.totalorder %s1229_s11, 2 }
   0xf   : > { %p83_p4 = scmp.ne.s32.totalorder %s933_s25, %s929_s24  ;;  %p84_p6 = scmp.eq.s32.totalorder %s751_s9, 0 }
  0x10   : > { %p1054_p5 = por %p78_p2, %p77_p1  ;;  %s1231_s11 = smov (%p35_p3, %s1229_s11), 0 }
  0x11   : > { %p1060_p7 = por %p84_p6, %p83_p4  ;;  %s65_s16 = ssub.s32 %s953_s30, %s1231_s11 }
  0x12   : > { %p793_p8 = scmp.lt.s32.totalorder %s957_s8, 4  ;;  %s67_s17 = sor.u32 %s66_s13, %s65_s16 }
  0x13   : > { %s270_s18 = sand.u32 1, %s937_s26   ;;  %p68_p9 = scmp.eq.s32.totalorder %s67_s17, 0 }
  0x14   : > { %s755_s19 = sshll.u32 %s270_s18, 2  ;;  %s756_s20 = sshll.u32 %s953_s30, 1 }
  0x15   : > { %s1070_s21 = scalar_select %p68_p9, %s937_s26, %s70_s12  }
  0x16   : > { %s279_s22 = sadd.s32 %s949_s29, %s756_s20  ;;  %s274_s24 = scalar_lea.vmem [#allocation2], %s755_s19 }
  0x17   : > { %s757_s23 = sshll.u32 %s279_s22, 6  ;;  %s283_s9 = sshll.u32 %s274_s24, 4  ;;  %s1078_s9 = int_to_ptr.vmem [resolvable:$true] %s283_s9 }
  0x18   : > { %s1212_s1 = sld [smem:[#allocation6_spill]]  ;;  %p1084_p10 = pnand %p793_p8, %p1054_p5 }
  0x19   : > { %s271_s13 = scalar_lea.sflag [#allocation3], %s270_s18 }
  0x1a   : > { %p863_p0 = pneg %p1084_p10 }
  0x1e   : > { %s1076_s2 = scalar_lea.hbm %s1212_s1, %s757_s23  ;;  %s866_s16 = scalar_lea.hbm %s1212_s1, 256 }
  0x1f   : > { %s861_s3 = scalar_lea.hbm %s1076_s2, 64  ;;  %p867_p3 = scmp.lt.u32.totalorder %s1076_s2, %s1212_s1 }
  0x20   : > { %p862_p13 = scmp.ne.s32.totalorder %s1076_s2, %s861_s3  ;;  %p868_p4 = scmp.lt.u32.totalorder %s866_s16, %s861_s3 }
  0x21   : > { %p870_p6 = scmp.lt.u32.totalorder %s861_s3, %s1076_s2 }
  0x22   : > { %p864_p1 = pnand %p863_p0, %p862_p13  ;;  %p869_p5 = por %p868_p4, %p867_p3 }
  0x24   : > { %p865_p2 = pneg %p864_p1  ;;  %p871_p8 = por %p870_p6, %p869_p5 }
  0x26   : > { %p872_p9 = pnand %p871_p8, %p865_p2 }
  0x28   : > { %875 = shalt.err (!%p872_p9)
}
  0x29   : > { %s876_s18 = scalar_lea.vmem %s1078_s9, 64  ;;  %s959_s20 = smov [#allocation2]  }
  0x2a   : > { %p877_p13 = scmp.ne.s32.totalorder %s1078_s9, %s876_s18  ;;  %s881_s22 = sshll.u32 %s959_s20, 4  ;;  %s882_s22 = int_to_ptr.vmem [resolvable:$false] %s881_s22 }
  0x2b   : > { %s883_s23 = scalar_lea.vmem %s882_s22, 128  ;;  %p884_p12 = scmp.lt.s32.totalorder %s1078_s9, %s882_s22 }
  0x2c   : > { %p879_p1 = pnand %p877_p13, %p863_p0  ;;  %p885_p3 = scmp.lt.s32.totalorder %s883_s23, %s876_s18 }
  0x2e   : > { %p880_p11 = pneg %p879_p1  ;;  %p886_p4 = por %p885_p3, %p884_p12 }
  0x30   : > { %p887_p5 = pnand %p886_p4, %p880_p11 }
  0x32   : > { %890 = shalt.err (!%p887_p5)
}
  0x33   : > { %792 = dma.hbm_to_vmem [thread:$0]  (!%p1084_p10), %s1076_s2, 64, %s1078_s9, %s271_s13  }
  0x34   : > { %p1214_p2 = scmp.lt.s32.totalorder %s957_s8, 5  ;;  %p1215_p6 = scmp.ge.s32.totalorder %s957_s8, 1 }
  0x36   : > { %p289_p0 = pnand %p1215_p6, %p1214_p2 }
  0x37   : > { %s294_s24 = sand.u32 (!%p289_p0), 1, %s933_s25  }
  0x38   : > { %292 = sbr.rel (%p289_p0) target bundleno = 448 (0x1c0), region = 36  ;;  %s1120_s3 = sshll.u32 (!%p289_p0), %s294_s24, 2 }
  0x39   : > { %s295_s10 = scalar_lea.sflag (!%p289_p0), [#allocation3], %s294_s24  ;;  %s298_s14 = scalar_lea.vmem (!%p289_p0), [#allocation2], %s1120_s3 }
  0x3f   : > { %924 = dma.done.wait (%p1060_p7), %s295_s10, 64  }
  0x40   : > { %926 = vsyncadd (%p1060_p7), %s295_s10, 4294967232  ;;  %p348_p10 = scmp.lt.s32.totalorder %s945_s28, 1  ;;  %p350_p11 = scmp.lt.s32.totalorder %s941_s27, 1 }
  0x41   : > { %p766_p7 = scmp.ne.s32.totalorder %s941_s27, 0 }
  0x42   : > { %s1233_s28 = smov (!%p348_p10, %s945_s28), 1  ;;  %vm376_vm0 = vcmask (!%p766_p7), 7168   ;;  %v960_v0 = vmov (!%p766_p7), 0.0  }
  0x43   : > { %s351_s2 = scalar_select %p350_p11, %s941_s27, 1 }
  0x44   : > { %s760_s9 = sshll.u32 %s1233_s28, 1  ;;  %s762_s12 = sshll.u32 %s1233_s28, 3 }
  0x45   : > { %s353_s13 = sadd.s32 %s760_s9, %s351_s2  ;;  %s1134_s19 = scalar_lea.vmem %s1201_s4, %s762_s12 }
  0x46   : > { %s761_s18 = sshll.u32 %s353_s13, 2  ;;  %s1139_s22 = scalar_lea.vmem %s1202_s5, %s762_s12  ;;  %377 = vst.msk [vmem:[%s1134_s19] sm:$0xff] (!%p766_p7), %vm376_vm0, %v960_v0 }
  0x47   : > { %s355_s3 = scalar_lea.vmem %s1197_s0, %s761_s18  ;;  %s1147_s28 = scalar_lea.vmem %s1203_s6, %s762_s12  ;;  %378 = vst.msk [vmem:[%s1139_s22] sm:$0xff] (!%p766_p7), %vm376_vm0, %v960_v0 }
  0x48   : > { %s1152_s16 = scalar_lea.vmem %s1204_s7, %s762_s12  ;;  %375 = sbr.rel (%p766_p7) target bundleno = 79 (0x4f), region = 44  ;;  %379 = vst.msk [vmem:[%s1147_s28] sm:$0xff] (!%p766_p7), %vm376_vm0, %v960_v0 }
  0x49   : > { %380 = vst.msk [vmem:[%s1152_s16] sm:$0xff] (!%p766_p7), %vm376_vm0, %v960_v0 }
  0x4f PF: > { %v381_v1 = vld [vmem:[%s355_s3] sm:$0xf]  ;;  %vm388_vm1 = vcmask 1043456   ;;  %v961_v2 = vmov 0.0   ;;  %s1216_s12 = sld [smem:[#allocation7_spill]]  ;;  %vm384_vm2 = vcmask 31744  }
  0x50   : > { %777 = vmatprep.subr.mxu0 %v961_v2  ;;  %782 = vmatprep.subr.mxu1 %v961_v2  ;;  %v382_v3 = vld [vmem:[%s298_s14] sm:$0xf]  ;;  %s1217_s18 = sld [smem:[#allocation8_spill]]  ;;  %vm962_vm3 = vmmov 0   ;;  %vm543_vm4 = vcmask 7168  }
  0x51   : > { %778 = vmatpush3.msk.msra.mxu0 %vm388_vm1, %v381_v1  ;;  %779 = vmatprep.mubr.msk.f32.mxu0 %vm962_vm3, %v961_v2  ;;  %v551_v12 = vld [vmem:[%s1147_s28] sm:$0xff] }
  0x52   : > { %783 = vmatpush3.msk.msra.mxu1 %vm388_vm1, %v382_v3  ;;  %784 = vmatprep.mubr.msk.f32.mxu1 %vm962_vm3, %v961_v2  ;;  %v539_v13 = vld [vmem:[%s1134_s19] sm:$0xff] }
  0x53   : > { %v556_v18 = vld [vmem:[%s1152_s16] sm:$0xff] }
  0x54   : > { %v545_v19 = vld [vmem:[%s1139_s22] sm:$0xff] }
  0x55   : > { %v383_v4 = vld [vmem:[%s1216_s12] sm:$0xff] }
  0x56   : > { %v462_v5 = vld [vmem:[%s1217_s18] sm:$0xff]  ;;  %780 = vmatmul.mubr.msk.f32.vlgmr.msra.gmra.mrb[0].mxu0 %vm384_vm2, %v383_v4 }
  0x57   : > { %785 = vmatmul.mubr.msk.f32.vlgmr.msra.gmra.mrb[0].mxu1 %vm384_vm2, %v462_v5 }
 0x129   : > { %v458_v6 = vpop.f32.mrb[0].mxu0 }
 0x12a   : > { %v535_v7 = vpop.f32.mrb[0].mxu1  ;;  %540 = vadd.xlane.f32.xlu0 %v458_v6  ;;  %v781_v9 = vpop.f32.mrb[1].mxu0  ;;  %v546_v11 = vmul.f32 %v458_v6, %v458_v6 }
 0x12b   : > { %552 = vadd.xlane.f32.xlu1 %v535_v7  ;;  %v786_v8 = vpop.f32.mrb[1].mxu1  ;;  %v557_v10 = vmul.f32 %v535_v7, %v535_v7 }
 0x12e   : > { %547 = vadd.xlane.f32.xlu0 %v546_v11 }
 0x12f   : > { %558 = vadd.xlane.f32.xlu1 %v557_v10 }
 0x1b7   : > { %v541_v15 = vpop.xlane.xlu0 %540 }
 0x1b8   : > { %v553_v14 = vpop.xlane.xlu1 %552  ;;  %v542_v17 = vadd.f32 %v541_v15, %v539_v13 }
 0x1b9   : > { %v554_v16 = vadd.f32 %v553_v14, %v551_v12 }
 0x1ba   : > { %544 = vst.msk [vmem:[%s1134_s19] sm:$0xff] %vm543_vm4, %v542_v17 }
 0x1bb   : > { %555 = vst.msk [vmem:[%s1147_s28] sm:$0xff] %vm543_vm4, %v554_v16  ;;  %v548_v21 = vpop.xlane.xlu0 %547 }
 0x1bc   : > { %v559_v20 = vpop.xlane.xlu1 %558  ;;  %v549_v23 = vadd.f32 %v548_v21, %v545_v19 }
 0x1bd   : > { %v560_v22 = vadd.f32 %v559_v20, %v556_v18 }
 0x1be   : > { %550 = vst.msk [vmem:[%s1139_s22] sm:$0xff] %vm543_vm4, %v549_v23 }
 0x1bf   : > { %561 = vst.msk [vmem:[%s1152_s16] sm:$0xff] %vm543_vm4, %v560_v22 }
 0x1c0 PF: > { %s21_s8 = sadd.s32 1, %s957_s8   ;;  %s1218_s14 = sld [smem:[#allocation5_spill]] }
 0x1c1   : > { %p18_p12 = scmp.ge.s32.totalorder %s21_s8, 6   ;;  %s1219_s24 = smov %s933_s25 }
 0x1c2   : > { %s1220_s25 = smov %s937_s26  ;;  %s1221_s26 = smov %s1070_s21 }
 0x1c3   : > { %s1222_s27 = smov %s949_s29  ;;  %s1223_s28 = smov %s953_s30 }
 0x1c4   : > { %s1225_s30 = smov %s1231_s11  ;;  %20 = sbr.rel (!%p18_p12) target bundleno = 9 (0x9), region = 119 }
 0x1c6   : > { %s1224_s29 = smov %s1218_s14 }
 0x1cb   :  { %623 = vsyncpa [#allocation3], 1 }
 0x1cc   :  { %625 = vsyncpa [#allocation3 + $0x1], 1 }

</bundles_post_ra>
